<compile_context>
chip_gen: v5e
topology: v5e:2x2
jax: 0.10.0
libtpu: 0.0.40
codegen_flags: <defaults>
</compile_context>

<pallas_src>
import functools

import jax
import jax.numpy as jnp
from jax import lax
from jax.experimental import pallas as pl
from jax.experimental.pallas import tpu as pltpu


# Keep double-buffered input blocks (~2x this) under v5e's 16 MiB scoped VMEM.
_TARGET_BLOCK_BYTES = 6 * 1024 * 1024


# --------------------------- avg == 'mean' kernel ----------------------------

def _mean_pool_kernel(x_ref, o_ref, acc_ref, *, seq_len, ts, needs_mask):
    """Accumulating mean over the sequence axis.

    x_ref:   (tb, ts, H) input tile (native dtype)
    o_ref:   (tb, H)     output tile (written on the last S-tile only)
    acc_ref: (tb, H)     f32 VMEM accumulator, persists across the S grid axis
    """
    s_idx = pl.program_id(1)

    @pl.when(s_idx == 0)
    def _():
        acc_ref[...] = jnp.zeros_like(acc_ref)

    x = x_ref[...].astype(jnp.float32)                       # (tb, ts, H)
    if needs_mask:
        # Last S-tile may be partial: zero out rows past the true sequence
        # length before accumulating (scale below uses the true seq_len).
        seq_ids = s_idx * ts + lax.broadcasted_iota(jnp.int32, (1, ts, 1), 1)
        x = jnp.where(seq_ids < seq_len, x, 0.0)
    acc_ref[...] += jnp.sum(x, axis=1)                       # (tb, H) f32

    @pl.when(s_idx == pl.num_programs(1) - 1)
    def _():
        o_ref[...] = (acc_ref[...] * (1.0 / seq_len)).astype(o_ref.dtype)


# ------------------------ avg == 'end' / 'cls' kernel ------------------------

def _index_pool_kernel(x_ref, o_ref, *, row_in_block):
    # x_ref: (tb, s_blk, H) — only the block containing the selected sequence
    # position was DMA'd from HBM.  row_in_block is a static Python int.
    o_ref[...] = x_ref[:, row_in_block, :]


# --------------------------------- wrapper -----------------------------------

def _round_down_to_8(n):
    return max(8, (n // 8) * 8)


def pooling_layer(x, avg: str = "mean"):
    """Pallas implementation of PoolingLayer.forward.

    Args:
      x:   (B, S, H) array.
      avg: 'mean' (default), 'end', or 'cls'.
    Returns:
      (B, H) array, same dtype as x.
    """
    B, S, H = x.shape
    out_shape = jax.ShapeDtypeStruct((B, H), x.dtype)
    itemsize = jnp.dtype(x.dtype).itemsize

    if avg in ("end", "cls"):
        idx = (S - 1) if avg == "end" else 0
        # Sequence block: 8 rows (sublane multiple) or the full S if S <= 8.
        s_blk = S if S <= 8 else 8
        blk = idx // s_blk
        row_in_block = idx - blk * s_blk
        # Batch tile: multiple of 8 (or full B) so the (tb, H) output block is
        # legal; sized so a block stays around the target bytes.
        if B <= 8:
            tb = B
        else:
            tb = _round_down_to_8(
                min(B, max(8, _TARGET_BLOCK_BYTES // max(1, s_blk * H * itemsize))))
            if tb >= B:
                tb = B
        grid = (pl.cdiv(B, tb),)
        kernel = functools.partial(_index_pool_kernel, row_in_block=row_in_block)
        return pl.pallas_call(
            kernel,
            out_shape=out_shape,
            grid_spec=pltpu.PrefetchScalarGridSpec(
                num_scalar_prefetch=0,
                grid=grid,
                in_specs=[pl.BlockSpec((tb, s_blk, H), lambda b: (b, blk, 0))],
                out_specs=pl.BlockSpec((tb, H), lambda b: (b, 0)),
            ),
            compiler_params=pltpu.CompilerParams(
                dimension_semantics=("parallel",)),
        )(x)

    # ---- avg == 'mean' (default) ----
    tb = B if B <= 8 else 8
    ts = max(1, _TARGET_BLOCK_BYTES // max(1, tb * H * itemsize))
    ts = min(_round_down_to_8(ts), S)          # multiple of 8, or full S
    needs_mask = (S % ts) != 0
    grid = (pl.cdiv(B, tb), pl.cdiv(S, ts))    # reduction (S) axis last
    kernel = functools.partial(
        _mean_pool_kernel, seq_len=S, ts=ts, needs_mask=needs_mask)
    return pl.pallas_call(
        kernel,
        out_shape=out_shape,
        grid_spec=pltpu.PrefetchScalarGridSpec(
            num_scalar_prefetch=0,
            grid=grid,
            in_specs=[pl.BlockSpec((tb, ts, H), lambda b, s: (b, s, 0))],
            out_specs=pl.BlockSpec((tb, H), lambda b, s: (b, 0)),
            scratch_shapes=[pltpu.VMEM((tb, H), jnp.float32)],
        ),
        compiler_params=pltpu.CompilerParams(
            dimension_semantics=("parallel", "arbitrary")),
    )(x)


if __name__ == "__main__":
    key = jax.random.PRNGKey(0)
    B, S, H = 2, 8, 32
    x = jax.random.normal(key, (B, S, H), dtype=jnp.float32)

    # Default mode ('mean'): mean over the sequence axis.
    out_mean = jax.block_until_ready(pooling_layer(x, avg="mean"))
    ref_mean = jnp.mean(x, axis=1)
    assert out_mean.shape == (B, H)
    assert jnp.allclose(out_mean, ref_mean, atol=1e-5, rtol=1e-5)

    # 'end' and 'cls' branches.
    out_end = jax.block_until_ready(pooling_layer(x, avg="end"))
    assert jnp.array_equal(out_end, x[:, -1, :])

    out_cls = jax.block_until_ready(pooling_layer(x, avg="cls"))
    assert jnp.array_equal(out_cls, x[:, 0, :])

    print("KERNEL_OK")
</pallas_src>

<mosaic_0001>
module attributes {stable_mosaic.version = 11 : i64} {
  func.func @_mean_pool_kernel(%arg0: i32, %arg1: i32, %arg2: memref<2x8x32xf32, #tpu.memory_space<vmem>>, %arg3: memref<2x32xf32, #tpu.memory_space<vmem>>, %arg4: memref<2x32xf32, #tpu.memory_space<vmem>>) attributes {dimension_semantics = [#tpu.dimension_semantics<parallel>, #tpu.dimension_semantics<arbitrary>], iteration_bounds = array<i64: 1, 1>, scalar_prefetch = 0 : i64, scratch_operands = 1 : i64, tpu.core_type = #tpu.core_type<tc>, window_params = [{transform_indices = @transform_0, window_bounds = array<i64: 2, 8, 32>}, {transform_indices = @transform_1, window_bounds = array<i64: 2, 32>}]} {
    %c0_i32 = arith.constant 0 : i32
    %0 = arith.cmpi eq, %arg1, %c0_i32 : i32
    %1 = arith.extui %0 : i1 to i32
    %c0_i32_0 = arith.constant 0 : i32
    %2 = arith.cmpi ne, %1, %c0_i32_0 : i32
    scf.if %2 {
      %cst_9 = arith.constant 0.000000e+00 : f32
      %11 = vector.broadcast %cst_9 : f32 to vector<2x32xf32>
      %c0_10 = arith.constant 0 : index
      %c0_11 = arith.constant 0 : index
      %12 = vector.load %arg4[%c0_10, %c0_11] : memref<2x32xf32, #tpu.memory_space<vmem>>, vector<2x32xf32>
      tpu.vector_store %arg4[%c0_10, %c0_11], %11 {strides = array<i32>} : memref<2x32xf32, #tpu.memory_space<vmem>>, vector<2x32xf32>,
    } else {
    }
    %c0 = arith.constant 0 : index
    %c0_1 = arith.constant 0 : index
    %c0_2 = arith.constant 0 : index
    %3 = vector.load %arg2[%c0, %c0_1, %c0_2] : memref<2x8x32xf32, #tpu.memory_space<vmem>>, vector<2x8x32xf32>
    %c0_3 = arith.constant 0 : index
    %c0_4 = arith.constant 0 : index
    %4 = vector.load %arg4[%c0_3, %c0_4] : memref<2x32xf32, #tpu.memory_space<vmem>>, vector<2x32xf32>
    %cst = arith.constant dense<0.000000e+00> : vector<2x32xf32>
    %5 = vector.multi_reduction <add>, %3, %cst [1] : vector<2x8x32xf32> to vector<2x32xf32>
    %6 = arith.addf %4, %5 : vector<2x32xf32>
    %c0_5 = arith.constant 0 : index
    %c0_6 = arith.constant 0 : index
    %7 = vector.load %arg4[%c0_5, %c0_6] : memref<2x32xf32, #tpu.memory_space<vmem>>, vector<2x32xf32>
    tpu.vector_store %arg4[%c0_5, %c0_6], %6 {strides = array<i32>} : memref<2x32xf32, #tpu.memory_space<vmem>>, vector<2x32xf32>,
    %c0_i32_7 = arith.constant 0 : i32
    %8 = arith.cmpi eq, %arg1, %c0_i32_7 : i32
    %9 = arith.extui %8 : i1 to i32
    %c0_i32_8 = arith.constant 0 : i32
    %10 = arith.cmpi ne, %9, %c0_i32_8 : i32
    scf.if %10 {
      %c0_9 = arith.constant 0 : index
      %c0_10 = arith.constant 0 : index
      %11 = vector.load %arg4[%c0_9, %c0_10] : memref<2x32xf32, #tpu.memory_space<vmem>>, vector<2x32xf32>
      %cst_11 = arith.constant 1.250000e-01 : f32
      %12 = vector.broadcast %cst_11 : f32 to vector<2x32xf32>
      %13 = arith.mulf %11, %12 : vector<2x32xf32>
      %c0_12 = arith.constant 0 : index
      %c0_13 = arith.constant 0 : index
      %14 = vector.load %arg3[%c0_12, %c0_13] : memref<2x32xf32, #tpu.memory_space<vmem>>, vector<2x32xf32>
      tpu.vector_store %arg3[%c0_12, %c0_13], %13 {strides = array<i32>} : memref<2x32xf32, #tpu.memory_space<vmem>>, vector<2x32xf32>,
    } else {
    }
    return
  }
  func.func @transform_0(%arg0: i32, %arg1: i32) -> (i32, i32, i32) {
    %c0_i32 = arith.constant 0 : i32
    %c0_i32_0 = arith.constant 0 : i32
    return %arg0, %arg1, %c0_i32 : i32, i32, i32
  }
  func.func @transform_1(%arg0: i32, %arg1: i32) -> (i32, i32) {
    %c0_i32 = arith.constant 0 : i32
    %c0_i32_0 = arith.constant 0 : i32
    return %arg0, %c0_i32 : i32, i32
  }
}

</mosaic_0001>

<bundles_post_ra>
// kernel: tpu_custom_call.1
= control target key start
LH: loop header
LB: loop body
LE: loop exit
PB: predicated region body
PF: predicated region fallthrough
CT: control target
= control target key end

     0   :  { %6 = vsyncpa [#allocation4], 0  ;;  %s161_s0 = inlined_call_operand.hbm [shape: f32[2,8,32], index: 0, kind: input, shape index: {}]   ;;  %s162_s1 = inlined_call_operand.hbm [shape: f32[2,32], index: 1, kind: output, shape index: {}]  }
   0x1   :  { %7 = vsyncpa [#allocation5], 0  ;;  %s12_s8 = sshll.u32 %s161_s0, 4  ;;  %s137_s9 = smov [#allocation3]   ;;  %s13_s8 = int_to_ptr.hbm [resolvable:$true] %s12_s8 }
   0x2   :  { %s14_s10 = sshll.u32 %s137_s9, 4  ;;  %s138_s11 = smov 128   ;;  %s15_s10 = int_to_ptr.vmem [resolvable:$true] %s14_s10 }
   0x3   :  { %s139_s12 = smov 8  }
   0x4   :  { %20 = dma.hbm_to_vmem [thread:$0]  %s13_s8, 256, %s15_s10, [#allocation4], %s138_s11, %s138_s11, %s139_s12  }
   0x5   :  { %133 = dma.done.wait [#allocation4], 256  }
   0x6   :  { %134 = vsyncadd [#allocation4], 4294967040  ;;  %vm29_vm0 = vcmask 254976   ;;  %v140_v0 = vmov 0.0   ;;  %vm34_vm1 = vcmask 261120   ;;  %v31_v1 = vld [vmem:[#allocation3] sm:$0xff] }
   0x7   :  { %30 = vst.msk [vmem:[#allocation2] sm:$0x3] %vm29_vm0, %v140_v0  ;;  %v32_v2 = vld [vmem:[#allocation3 + $0x8] sm:$0xff]  ;;  %v35_v3 = vsel %vm34_vm1, %v31_v1, 0.0  ;;  %vm51_vm2 = vcmask 1041409   ;;  %s141_s0 = smov [#allocation6]  }
   0x8   :  { %v42_v4 = vsel %vm34_vm1, %v32_v2, 0.0  ;;  %v36_v5 = vrot.slane %v35_v3, 4  ;;  %s68_s13 = sshll.u32 %s141_s0, 4  ;;  %s70_s16 = sshll.u32 %s162_s1, 4  ;;  %s69_s13 = int_to_ptr.vmem [resolvable:$true] %s68_s13  ;;  %s71_s16 = int_to_ptr.hbm [resolvable:$true] %s70_s16 }
   0x9   :  { %v43_v6 = vrot.slane %v42_v4, 4 }
   0xa   :  { %v37_v7 = vadd.f32 %v36_v5, %v35_v3 }
   0xb   :  { %v44_v8 = vadd.f32 %v43_v6, %v42_v4 }
   0xc   :  { %v38_v9 = vrot.slane %v37_v7, 2 }
   0xd   :  { %v45_v10 = vrot.slane %v44_v8, 2 }
   0xe   :  { %v39_v11 = vadd.f32 %v38_v9, %v37_v7  ;;  %v33_v15 = vld [vmem:[#allocation2] sm:$0x3] }
   0xf   :  { %v46_v12 = vadd.f32 %v45_v10, %v44_v8 }
  0x10   :  { %v40_v13 = vrot.slane %v39_v11, 1 }
  0x11   :  { %v47_v14 = vrot.slane %v46_v12, 1 }
  0x12   :  { %v41_v16 = vadd.f32 %v40_v13, %v39_v11 }
  0x13   :  { %v48_v17 = vadd.f32 %v47_v14, %v46_v12 }
  0x15   :  { %v52_v18 = vsel %vm51_vm2, %v48_v17, %v41_v16 }
  0x16   :  { %v54_v19 = vadd.f32 %v52_v18, %v33_v15 }
  0x18   :  { %56 = vst.msk [vmem:[#allocation2] sm:$0x3] %vm29_vm0, %v54_v19 }
  0x1f   :  { %v60_v20 = vld [vmem:[#allocation2] sm:$0x3] }
  0x20   :  { %v61_v21 = vmul.f32 0.125, %v60_v20 }
  0x22   :  { %62 = vst.msk [vmem:[#allocation6] sm:$0x3] %vm29_vm0, %v61_v21 }
  0x23   :  { %73 = dma.vmem_to_hbm [thread:$0]  %s69_s13, 32, %s71_s16, [#allocation5]  }
  0x24   :  { %135 = dma.done.wait [#allocation5], 32  }
  0x25   :  { %136 = vsyncadd [#allocation5], 4294967264 }
  0x26   :  { %78 = vsyncpa [#allocation4], 1 }
  0x27   :  { %79 = vsyncpa [#allocation5], 1 }

</bundles_post_ra>
